<compile_context>
chip_gen: v7x
topology: tpu7x:2x2x1
jax: 0.10.0
libtpu: 0.0.40
codegen_flags: <defaults>
</compile_context>

<pallas_src>
import jax
import jax.numpy as jnp
from jax import lax
from jax.experimental import pallas as pl
from jax.experimental.pallas import tpu as pltpu


def _fused_spike_basic_block_kernel(x_ref, w1_ref, w2_ref, o_ref,
                                    xpad_ref, ypad_ref):
    # x_ref : (H, W*Cin)         bf16 (one batch element, lane-dense)
    # w1_ref: (3, W*Cin, W*Cmid) bf16 banded conv1 weights (one band per ky)
    # w2_ref: (3, W*Cmid, W*Cout) bf16 banded conv2 weights
    # o_ref : (H, W*Cout)        f32
    # xpad_ref: (H+2, W*Cin)  bf16 VMEM scratch (row-halo'd input)
    # ypad_ref: (H+2, W*Cmid) bf16 VMEM scratch (row-halo'd conv1 output)
    H = o_ref.shape[0]
    f32 = jnp.float32

    # ---- stage input with a 1-row zero halo in VMEM (no HBM-side jnp.pad) ----
    # Only the halo rows need zeroing; interior rows are fully overwritten.
    zero_x = jnp.zeros((1, xpad_ref.shape[1]), xpad_ref.dtype)
    xpad_ref[0:1, :] = zero_x
    xpad_ref[H + 1:H + 2, :] = zero_x
    xpad_ref[1:H + 1, :] = x_ref[...]

    # ---- conv1 + relu1: three banded matmuls, K = W*Cin (=128), M=H, N=W*Cmid ----
    acc = jnp.dot(xpad_ref[0:H, :], w1_ref[0], preferred_element_type=f32)
    acc += jnp.dot(xpad_ref[1:H + 1, :], w1_ref[1], preferred_element_type=f32)
    acc += jnp.dot(xpad_ref[2:H + 2, :], w1_ref[2], preferred_element_type=f32)
    y = jnp.maximum(acc, 0.0)

    # ---- stage conv1 output (row halo) in VMEM for conv2; never touches HBM ----
    zero_y = jnp.zeros((1, ypad_ref.shape[1]), ypad_ref.dtype)
    ypad_ref[0:1, :] = zero_y
    ypad_ref[H + 1:H + 2, :] = zero_y
    ypad_ref[1:H + 1, :] = y.astype(ypad_ref.dtype)

    # ---- conv2 + residual + relu2 (residual = x, already resident in VMEM) ----
    acc2 = jnp.dot(ypad_ref[0:H, :], w2_ref[0], preferred_element_type=f32)
    acc2 += jnp.dot(ypad_ref[1:H + 1, :], w2_ref[1], preferred_element_type=f32)
    acc2 += jnp.dot(ypad_ref[2:H + 2, :], w2_ref[2], preferred_element_type=f32)
    out = acc2 + xpad_ref[1:H + 1, :].astype(f32)
    o_ref[...] = jnp.maximum(out, 0.0).astype(o_ref.dtype)


def spike_basic_block_forward(x_nchw, w1_banded, w2_banded):
    """SpikeBasicBlock.forward (ANN-mode). x is NCHW; weights are banded
    [3, W*Cin, W*Cout] tensors produced by `_oihw_to_banded` (bf16)."""
    N, C, H, W = x_nchw.shape
    WCin = W * C
    WCmid = w1_banded.shape[-1]
    WCout = w2_banded.shape[-1]
    if w1_banded.shape[1] != WCin or w2_banded.shape[1] != WCmid:
        raise ValueError("banded weight shapes inconsistent with input width/channels")
    if WCout != WCin:
        # downsample is None in this block, so the residual add requires Cin == Cout.
        raise ValueError("residual path requires inplanes == planes (downsample=None)")

    # NCHW -> NHWC -> lane-dense (N, H, W*C); reshape is layout-free, bf16 halves DMA.
    x2d = jnp.transpose(x_nchw, (0, 2, 3, 1)).reshape(N, H, WCin).astype(jnp.bfloat16)

    out2d = pl.pallas_call(
        _fused_spike_basic_block_kernel,
        out_shape=jax.ShapeDtypeStruct((N, H, WCout), jnp.float32),
        grid=(N,),
        in_specs=[
            pl.BlockSpec((None, H, WCin), lambda n: (n, 0, 0)),
            # constant index_map -> weights are not re-fetched per grid step
            # (at real sizes: pipeline_mode=pl.Buffered(1) to single-buffer them).
            pl.BlockSpec((3, WCin, WCmid), lambda n: (0, 0, 0)),
            pl.BlockSpec((3, WCmid, WCout), lambda n: (0, 0, 0)),
        ],
        out_specs=pl.BlockSpec((None, H, WCout), lambda n: (n, 0, 0)),
        scratch_shapes=[
            pltpu.VMEM((H + 2, WCin), jnp.bfloat16),   # row-halo'd input
            pltpu.VMEM((H + 2, WCmid), jnp.bfloat16),  # row-halo'd conv1 output
        ],
        compiler_params=pltpu.CompilerParams(dimension_semantics=("parallel",)),
    )(x2d, w1_banded, w2_banded)

    Cout = WCout // W
    out = out2d.reshape(N, H, W, Cout)
    return jnp.transpose(out, (0, 3, 1, 2)).astype(x_nchw.dtype)


def _oihw_to_banded(w_oihw, width):
    """PyTorch conv weight [Cout, Cin, 3, 3] -> banded matmul form [3, W*Cin, W*Cout].

    banded[ky, c*Cin+ci, q*Cout+co] = w[co, ci, ky, c-q+1] when 0 <= c-q+1 <= 2,
    else 0.  The band structure folds the conv's left/right zero padding into
    the weight, so the kernel only has to handle the row (H) halo.
    """
    cout, cin = w_oihw.shape[0], w_oihw.shape[1]
    w = jnp.transpose(w_oihw, (2, 3, 1, 0))            # (ky, kx, Cin, Cout)
    c = jnp.arange(width)[:, None]                     # source column index
    q = jnp.arange(width)[None, :]                     # output column index
    kx = c - q + 1                                     # (width, width)
    valid = (kx >= 0) & (kx <= 2)
    g = w[:, jnp.clip(kx, 0, 2), :, :]                 # (3, c, q, Cin, Cout)
    g = jnp.where(valid[None, :, :, None, None], g, 0.0)
    g = jnp.transpose(g, (0, 1, 3, 2, 4))              # (ky, c, Cin, q, Cout)
    return g.reshape(3, width * cin, width * cout)


def _reference(x, w1_oihw, w2_oihw):
    dn = lax.conv_dimension_numbers(x.shape, w1_oihw.shape, ("NCHW", "OIHW", "NCHW"))
    o = lax.conv_general_dilated(x, w1_oihw, (1, 1), ((1, 1), (1, 1)),
                                 dimension_numbers=dn)
    o = jnp.maximum(o, 0.0)
    o2 = lax.conv_general_dilated(o, w2_oihw, (1, 1), ((1, 1), (1, 1)),
                                  dimension_numbers=dn)
    return jnp.maximum(o2 + x, 0.0)


if __name__ == "__main__":
    # Small shapes: batch=2, inplanes=planes=8, spatial=16x16 (W*C = 128 lanes),
    # stride=1, downsample=None.
    N, C, H, W = 2, 8, 16, 16
    planes = 8

    key = jax.random.PRNGKey(0)
    k_x, k_w1, k_w2 = jax.random.split(key, 3)
    x = jax.random.normal(k_x, (N, C, H, W), jnp.float32)
    w1_oihw = jax.random.normal(k_w1, (planes, C, 3, 3), jnp.float32) * 0.1
    w2_oihw = jax.random.normal(k_w2, (planes, planes, 3, 3), jnp.float32) * 0.1

    w1_banded = _oihw_to_banded(w1_oihw, W).astype(jnp.bfloat16)
    w2_banded = _oihw_to_banded(w2_oihw, W).astype(jnp.bfloat16)

    out = jax.jit(spike_basic_block_forward)(x, w1_banded, w2_banded)
    out = jax.block_until_ready(out)

    ref = _reference(x, w1_oihw, w2_oihw)
    assert out.shape == (N, planes, H, W)
    max_err = float(jnp.max(jnp.abs(out - ref)))
    # bf16 activations/weights into the MXU -> loosen tolerance vs the f32 reference.
    assert jnp.allclose(out, ref, atol=5e-2, rtol=5e-2), (
        f"mismatch vs XLA conv reference (max abs err {max_err})")

    print("KERNEL_OK")
</pallas_src>

<mosaic_0001>
module attributes {stable_mosaic.version = 11 : i64} {
  func.func @_fused_spike_basic_block_kernel(%arg0: i32, %arg1: memref<1x16x128xbf16, #tpu.memory_space<vmem>>, %arg2: memref<3x128x128xbf16, #tpu.memory_space<vmem>>, %arg3: memref<3x128x128xbf16, #tpu.memory_space<vmem>>, %arg4: memref<1x16x128xf32, #tpu.memory_space<vmem>>, %arg5: memref<18x128xbf16, #tpu.memory_space<vmem>>, %arg6: memref<18x128xbf16, #tpu.memory_space<vmem>>) attributes {dimension_semantics = [#tpu.dimension_semantics<parallel>], iteration_bounds = array<i64: 2>, scalar_prefetch = 0 : i64, scratch_operands = 2 : i64, tpu.core_type = #tpu.core_type<tc>, window_params = [{transform_indices = @transform_0, window_bounds = array<i64: 1, 16, 128>}, {pipeline_mode = #tpu.pipeline_mode<synchronous>, transform_indices = @transform_1, window_bounds = array<i64: 3, 128, 128>}, {pipeline_mode = #tpu.pipeline_mode<synchronous>, transform_indices = @transform_2, window_bounds = array<i64: 3, 128, 128>}, {transform_indices = @transform_3, window_bounds = array<i64: 1, 16, 128>}]} {
    %cst = arith.constant 0.000000e+00 : bf16
    %0 = vector.broadcast %cst : bf16 to vector<1x128xbf16>
    %c0 = arith.constant 0 : index
    %c0_0 = arith.constant 0 : index
    %1 = vector.load %arg5[%c0, %c0_0] : memref<18x128xbf16, #tpu.memory_space<vmem>>, vector<1x128xbf16>
    tpu.vector_store %arg5[%c0, %c0_0], %0 {strides = array<i32>} : memref<18x128xbf16, #tpu.memory_space<vmem>>, vector<1x128xbf16>,
    %c17 = arith.constant 17 : index
    %c0_1 = arith.constant 0 : index
    %2 = vector.load %arg5[%c17, %c0_1] : memref<18x128xbf16, #tpu.memory_space<vmem>>, vector<1x128xbf16>
    tpu.vector_store %arg5[%c17, %c0_1], %0 {strides = array<i32>} : memref<18x128xbf16, #tpu.memory_space<vmem>>, vector<1x128xbf16>,
    %c0_2 = arith.constant 0 : index
    %c0_3 = arith.constant 0 : index
    %c0_4 = arith.constant 0 : index
    %3 = vector.load %arg1[%c0_2, %c0_3, %c0_4] : memref<1x16x128xbf16, #tpu.memory_space<vmem>>, vector<1x16x128xbf16>
    %4 = vector.shape_cast %3 : vector<1x16x128xbf16> to vector<16x128xbf16>
    %c1 = arith.constant 1 : index
    %c0_5 = arith.constant 0 : index
    %5 = vector.load %arg5[%c1, %c0_5] : memref<18x128xbf16, #tpu.memory_space<vmem>>, vector<16x128xbf16>
    tpu.vector_store %arg5[%c1, %c0_5], %4 {strides = array<i32>} : memref<18x128xbf16, #tpu.memory_space<vmem>>, vector<16x128xbf16>,
    %c0_6 = arith.constant 0 : index
    %c0_7 = arith.constant 0 : index
    %6 = vector.load %arg5[%c0_6, %c0_7] : memref<18x128xbf16, #tpu.memory_space<vmem>>, vector<16x128xbf16>
    %c0_8 = arith.constant 0 : index
    %c0_9 = arith.constant 0 : index
    %c0_10 = arith.constant 0 : index
    %7 = vector.load %arg2[%c0_8, %c0_9, %c0_10] : memref<3x128x128xbf16, #tpu.memory_space<vmem>>, vector<1x128x128xbf16>
    %8 = vector.shape_cast %7 : vector<1x128x128xbf16> to vector<128x128xbf16>
    %cst_11 = arith.constant dense<0.000000e+00> : vector<16x128xf32>
    %9 = tpu.matmul %6, %8, %cst_11 {dimension_numbers = #tpu.dot_dimension_numbers<[1], [0], [0], [1], [0, 0, 1, 1], [], []>} : vector<16x128xbf16>, vector<128x128xbf16>, vector<16x128xf32> -> vector<16x128xf32>
    %c1_12 = arith.constant 1 : index
    %c0_13 = arith.constant 0 : index
    %10 = vector.load %arg5[%c1_12, %c0_13] : memref<18x128xbf16, #tpu.memory_space<vmem>>, vector<16x128xbf16>
    %c1_14 = arith.constant 1 : index
    %c0_15 = arith.constant 0 : index
    %c0_16 = arith.constant 0 : index
    %11 = vector.load %arg2[%c1_14, %c0_15, %c0_16] : memref<3x128x128xbf16, #tpu.memory_space<vmem>>, vector<1x128x128xbf16>
    %12 = vector.shape_cast %11 : vector<1x128x128xbf16> to vector<128x128xbf16>
    %cst_17 = arith.constant dense<0.000000e+00> : vector<16x128xf32>
    %13 = tpu.matmul %10, %12, %cst_17 {dimension_numbers = #tpu.dot_dimension_numbers<[1], [0], [0], [1], [0, 0, 1, 1], [], []>} : vector<16x128xbf16>, vector<128x128xbf16>, vector<16x128xf32> -> vector<16x128xf32>
    %14 = arith.addf %9, %13 : vector<16x128xf32>
    %c2 = arith.constant 2 : index
    %c0_18 = arith.constant 0 : index
    %15 = vector.load %arg5[%c2, %c0_18] : memref<18x128xbf16, #tpu.memory_space<vmem>>, vector<16x128xbf16>
    %c2_19 = arith.constant 2 : index
    %c0_20 = arith.constant 0 : index
    %c0_21 = arith.constant 0 : index
    %16 = vector.load %arg2[%c2_19, %c0_20, %c0_21] : memref<3x128x128xbf16, #tpu.memory_space<vmem>>, vector<1x128x128xbf16>
    %17 = vector.shape_cast %16 : vector<1x128x128xbf16> to vector<128x128xbf16>
    %cst_22 = arith.constant dense<0.000000e+00> : vector<16x128xf32>
    %18 = tpu.matmul %15, %17, %cst_22 {dimension_numbers = #tpu.dot_dimension_numbers<[1], [0], [0], [1], [0, 0, 1, 1], [], []>} : vector<16x128xbf16>, vector<128x128xbf16>, vector<16x128xf32> -> vector<16x128xf32>
    %19 = arith.addf %14, %18 : vector<16x128xf32>
    %cst_23 = arith.constant 0.000000e+00 : f32
    %20 = vector.broadcast %cst_23 : f32 to vector<16x128xf32>
    %21 = arith.maximumf %19, %20 : vector<16x128xf32>
    %cst_24 = arith.constant 0.000000e+00 : bf16
    %22 = vector.broadcast %cst_24 : bf16 to vector<1x128xbf16>
    %c0_25 = arith.constant 0 : index
    %c0_26 = arith.constant 0 : index
    %23 = vector.load %arg6[%c0_25, %c0_26] : memref<18x128xbf16, #tpu.memory_space<vmem>>, vector<1x128xbf16>
    tpu.vector_store %arg6[%c0_25, %c0_26], %22 {strides = array<i32>} : memref<18x128xbf16, #tpu.memory_space<vmem>>, vector<1x128xbf16>,
    %c17_27 = arith.constant 17 : index
    %c0_28 = arith.constant 0 : index
    %24 = vector.load %arg6[%c17_27, %c0_28] : memref<18x128xbf16, #tpu.memory_space<vmem>>, vector<1x128xbf16>
    tpu.vector_store %arg6[%c17_27, %c0_28], %22 {strides = array<i32>} : memref<18x128xbf16, #tpu.memory_space<vmem>>, vector<1x128xbf16>,
    %25 = arith.truncf %21 : vector<16x128xf32> to vector<16x128xbf16>
    %c1_29 = arith.constant 1 : index
    %c0_30 = arith.constant 0 : index
    %26 = vector.load %arg6[%c1_29, %c0_30] : memref<18x128xbf16, #tpu.memory_space<vmem>>, vector<16x128xbf16>
    tpu.vector_store %arg6[%c1_29, %c0_30], %25 {strides = array<i32>} : memref<18x128xbf16, #tpu.memory_space<vmem>>, vector<16x128xbf16>,
    %c0_31 = arith.constant 0 : index
    %c0_32 = arith.constant 0 : index
    %27 = vector.load %arg6[%c0_31, %c0_32] : memref<18x128xbf16, #tpu.memory_space<vmem>>, vector<16x128xbf16>
    %c0_33 = arith.constant 0 : index
    %c0_34 = arith.constant 0 : index
    %c0_35 = arith.constant 0 : index
    %28 = vector.load %arg3[%c0_33, %c0_34, %c0_35] : memref<3x128x128xbf16, #tpu.memory_space<vmem>>, vector<1x128x128xbf16>
    %29 = vector.shape_cast %28 : vector<1x128x128xbf16> to vector<128x128xbf16>
    %cst_36 = arith.constant dense<0.000000e+00> : vector<16x128xf32>
    %30 = tpu.matmul %27, %29, %cst_36 {dimension_numbers = #tpu.dot_dimension_numbers<[1], [0], [0], [1], [0, 0, 1, 1], [], []>} : vector<16x128xbf16>, vector<128x128xbf16>, vector<16x128xf32> -> vector<16x128xf32>
    %c1_37 = arith.constant 1 : index
    %c0_38 = arith.constant 0 : index
    %31 = vector.load %arg6[%c1_37, %c0_38] : memref<18x128xbf16, #tpu.memory_space<vmem>>, vector<16x128xbf16>
    %c1_39 = arith.constant 1 : index
    %c0_40 = arith.constant 0 : index
    %c0_41 = arith.constant 0 : index
    %32 = vector.load %arg3[%c1_39, %c0_40, %c0_41] : memref<3x128x128xbf16, #tpu.memory_space<vmem>>, vector<1x128x128xbf16>
    %33 = vector.shape_cast %32 : vector<1x128x128xbf16> to vector<128x128xbf16>
    %cst_42 = arith.constant dense<0.000000e+00> : vector<16x128xf32>
    %34 = tpu.matmul %31, %33, %cst_42 {dimension_numbers = #tpu.dot_dimension_numbers<[1], [0], [0], [1], [0, 0, 1, 1], [], []>} : vector<16x128xbf16>, vector<128x128xbf16>, vector<16x128xf32> -> vector<16x128xf32>
    %35 = arith.addf %30, %34 : vector<16x128xf32>
    %c2_43 = arith.constant 2 : index
    %c0_44 = arith.constant 0 : index
    %36 = vector.load %arg6[%c2_43, %c0_44] : memref<18x128xbf16, #tpu.memory_space<vmem>>, vector<16x128xbf16>
    %c2_45 = arith.constant 2 : index
    %c0_46 = arith.constant 0 : index
    %c0_47 = arith.constant 0 : index
    %37 = vector.load %arg3[%c2_45, %c0_46, %c0_47] : memref<3x128x128xbf16, #tpu.memory_space<vmem>>, vector<1x128x128xbf16>
    %38 = vector.shape_cast %37 : vector<1x128x128xbf16> to vector<128x128xbf16>
    %cst_48 = arith.constant dense<0.000000e+00> : vector<16x128xf32>
    %39 = tpu.matmul %36, %38, %cst_48 {dimension_numbers = #tpu.dot_dimension_numbers<[1], [0], [0], [1], [0, 0, 1, 1], [], []>} : vector<16x128xbf16>, vector<128x128xbf16>, vector<16x128xf32> -> vector<16x128xf32>
    %40 = arith.addf %35, %39 : vector<16x128xf32>
    %c1_49 = arith.constant 1 : index
    %c0_50 = arith.constant 0 : index
    %41 = vector.load %arg5[%c1_49, %c0_50] : memref<18x128xbf16, #tpu.memory_space<vmem>>, vector<16x128xbf16>
    %42 = arith.extf %41 : vector<16x128xbf16> to vector<16x128xf32>
    %43 = arith.addf %40, %42 : vector<16x128xf32>
    %cst_51 = arith.constant 0.000000e+00 : f32
    %44 = vector.broadcast %cst_51 : f32 to vector<16x128xf32>
    %45 = arith.maximumf %43, %44 : vector<16x128xf32>
    %c0_52 = arith.constant 0 : index
    %c0_53 = arith.constant 0 : index
    %c0_54 = arith.constant 0 : index
    %46 = vector.load %arg4[%c0_52, %c0_53, %c0_54] : memref<1x16x128xf32, #tpu.memory_space<vmem>>, vector<1x16x128xf32>
    %47 = vector.shape_cast %46 : vector<1x16x128xf32> to vector<16x128xf32>
    %48 = vector.shape_cast %45 : vector<16x128xf32> to vector<1x16x128xf32>
    tpu.vector_store %arg4[%c0_52, %c0_53, %c0_54], %48 {strides = array<i32>} : memref<1x16x128xf32, #tpu.memory_space<vmem>>, vector<1x16x128xf32>,
    return
  }
  func.func @transform_0(%arg0: i32) -> (i32, i32, i32) {
    %c0_i32 = arith.constant 0 : i32
    %c0_i32_0 = arith.constant 0 : i32
    %c0_i32_1 = arith.constant 0 : i32
    return %arg0, %c0_i32, %c0_i32_0 : i32, i32, i32
  }
  func.func @transform_1(%arg0: i32) -> (i32, i32, i32) {
    %c0_i32 = arith.constant 0 : i32
    %c0_i32_0 = arith.constant 0 : i32
    %c0_i32_1 = arith.constant 0 : i32
    %c0_i32_2 = arith.constant 0 : i32
    return %c0_i32, %c0_i32_0, %c0_i32_1 : i32, i32, i32
  }
  func.func @transform_2(%arg0: i32) -> (i32, i32, i32) {
    %c0_i32 = arith.constant 0 : i32
    %c0_i32_0 = arith.constant 0 : i32
    %c0_i32_1 = arith.constant 0 : i32
    %c0_i32_2 = arith.constant 0 : i32
    return %c0_i32, %c0_i32_0, %c0_i32_1 : i32, i32, i32
  }
  func.func @transform_3(%arg0: i32) -> (i32, i32, i32) {
    %c0_i32 = arith.constant 0 : i32
    %c0_i32_0 = arith.constant 0 : i32
    %c0_i32_1 = arith.constant 0 : i32
    return %arg0, %c0_i32, %c0_i32_0 : i32, i32, i32
  }
}

</mosaic_0001>

<bundles_post_ra>
// kernel: spike_basic_block_forward.1
= control target key start
LH: loop header
LB: loop body
LE: loop exit
PB: predicated region body
PF: predicated region fallthrough
CT: control target
= control target key end

     0   :  { %s1456_s12 = smov 0   ;;  %s1727_s0 = inlined_call_operand.vmem [shape: bf16[2,16,128], index: 0, kind: input, shape index: {}]   ;;  %s1728_s1 = inlined_call_operand.vmem [shape: bf16[3,128,128], index: 1, kind: input, shape index: {}]   ;;  %s1729_s2 = inlined_call_operand.vmem [shape: bf16[3,128,128], index: 2, kind: input, shape index: {}]   ;;  %s1730_s3 = inlined_call_operand.vmem [shape: f32[2,16,128], index: 3, kind: output, shape index: {}]  }
   0x1 LB: > { %s1041_s13 = sadd.s32 4294967295, %s1432_s12   ;;  %p1045_p0 = scmp.ge.s32.totalorder %s1432_s12, 1  ;;  %s1432_s12 = sphi %s1456_s12, %s13_s12  }
   0x2   : > { %p137_p1 = scmp.lt.s32.totalorder %s1432_s12, 3 }
   0x4   : > { %p138_p2 = pnand %p1045_p0, %p137_p1 }
   0x5   : > { %v1372_v0 = vld [vmem:[%s1728_s1 + $0x40] sm:$0xff] (!%p138_p2)   ;;  %v1434_v1 = vmov (!%p138_p2), 0.0   ;;  %v1373_v2 = vld [vmem:[%s1728_s1 + $0x48] sm:$0xff] (!%p138_p2)   ;;  %vm1435_vm0 = vmmov (!%p138_p2), 0   ;;  %p161_p3 = scmp.lt.s32.totalorder (!%p138_p2), %s1041_s13, 1  ;;  %v1374_v3 = vld [vmem:[%s1728_s1 + $0x50] sm:$0xff] (!%p138_p2)  }
   0x6   : > { %141 = sbr.rel (%p138_p2) target bundleno = 632 (0x278), region = 32  ;;  %1234 = vmatprep.subr.bf16.mxu0 (!%p138_p2), %v1434_v1  ;;  %1294 = vmatprep.subr.bf16.mxu1 (!%p138_p2), %v1434_v1  ;;  %vm172_vm1 = vcmask (!%p138_p2), 1040384   ;;  %v1375_v4 = vld [vmem:[%s1728_s1 + $0x58] sm:$0xff] (!%p138_p2)   ;;  %vm173_vm2 = vsmask.f32 (!%p138_p2), 256  ;;  %vm207_vm7 = vcmask (!%p138_p2), 1043456  }
   0x7   : > { %1235 = vmatpush3.bf16.msra.mxu0 (!%p138_p2), %v1372_v0  ;;  %1250 = vmatprep.mubr.msk.bf16.mxu0 (!%p138_p2), %vm1435_vm0, %v1434_v1  ;;  %v175_v5 = vld [vmem:[#allocation2] sm:$0x1] (!%p138_p2)  ;;  %vm178_vm3 = vsmask.f32 (!%p138_p2), 7938  ;;  %vm1491_vm4 = vmand (!%p138_p2), %vm172_vm1, %vm173_vm2  ;;  %v180_v7 = vld [vmem:[#allocation2 + $0x8] sm:$0x1] (!%p138_p2) }
   0x8   : > { %1236 = vmatprep.subr.bf16.mxu0 (!%p138_p2), %v1434_v1  ;;  %1310 = vmatprep.mubr.msk.bf16.mxu1 (!%p138_p2), %vm1435_vm0, %v1434_v1  ;;  %v176_v9 = vsel (!%p138_p2), %vm1491_vm4, 0, %v175_v5  ;;  %vm1498_vm5 = vmand (!%p138_p2), %vm172_vm1, %vm178_vm3  ;;  %vm185_vm6 = vsmask.f32 (!%p138_p2), 4368  ;;  %v1376_v18 = vld [vmem:[%s1728_s1 + $0x60] sm:$0xff] (!%p138_p2)   ;;  %v1377_v27 = vld [vmem:[%s1728_s1 + $0x68] sm:$0xff] (!%p138_p2)   ;;  %vm474_vm11 = vcmask (!%p138_p2), 1046528  }
   0x9   : > { %177 = vst [vmem:[#allocation2] sm:$0x1] (!%p138_p2), %v176_v9  ;;  %v181_v13 = vsel (!%p138_p2), %vm1498_vm5, 0, %v180_v7  ;;  %vm1509_vm8 = vmor (!%p138_p2), %vm173_vm2, %vm185_vm6  ;;  %v1378_v32 = vld [vmem:[%s1728_s1 + $0x70] sm:$0xff] (!%p138_p2)   ;;  %v1379_v34 = vld [vmem:[%s1728_s1 + $0x78] sm:$0xff] (!%p138_p2)  }
   0xa   : > { %182 = vst [vmem:[#allocation2 + $0x8] sm:$0x1] (!%p138_p2), %v181_v13  ;;  %vm1515_vm9 = vmand (!%p138_p2), %vm207_vm7, %vm178_vm3  ;;  %vm260_vm10 = vsmask.f32 (!%p138_p2), 7424  ;;  %v1399_v43 = vld [vmem:[%s1729_s2 + $0x40] sm:$0xff] (!%p138_p2)   ;;  %v1383_v52 = vld [vmem:[%s1728_s1 + $0x8] sm:$0xff] (!%p138_p2)  }
   0xb   : > { %1237 = vmatpush3.bf16.msra.mxu0 (!%p138_p2), %v1373_v2  ;;  %v1382_v47 = vld [vmem:[%s1728_s1] sm:$0xff] (!%p138_p2)   ;;  %1295 = vmatpush3.bf16.msra.mxu1 (!%p138_p2), %v1399_v43  ;;  %v1384_v53 = vld [vmem:[%s1728_s1 + $0x10] sm:$0xff] (!%p138_p2)   ;;  %v1385_v54 = vld [vmem:[%s1728_s1 + $0x18] sm:$0xff] (!%p138_p2)  }
   0xc   : > { %1238 = vmatprep.subr.bf16.mxu0 (!%p138_p2), %v1434_v1  ;;  %1296 = vmatprep.subr.bf16.mxu1 (!%p138_p2), %v1434_v1  ;;  %v1386_v55 = vld [vmem:[%s1728_s1 + $0x20] sm:$0xff] (!%p138_p2)   ;;  %v1387_v56 = vld [vmem:[%s1728_s1 + $0x28] sm:$0xff] (!%p138_p2)   ;;  %v1388_v57 = vld [vmem:[%s1728_s1 + $0x30] sm:$0xff] (!%p138_p2)  }
   0xd   : > { %s1740_s13 = smov (!%p161_p3, %s1041_s13), 1  ;;  %v1389_v58 = vld [vmem:[%s1728_s1 + $0x38] sm:$0xff]   ;;  %v1390_v59 = vld [vmem:[%s1728_s1 + $0x80] sm:$0xff]   ;;  %v1391_v60 = vld [vmem:[%s1728_s1 + $0x88] sm:$0xff]  }
   0xe   : > { %s1172_s20 = sshll.u32 %s1740_s13, 3  ;;  %v1392_v61 = vld [vmem:[%s1728_s1 + $0x90] sm:$0xff]   ;;  %v1393_v62 = vld [vmem:[%s1728_s1 + $0x98] sm:$0xff]   ;;  %v1394_v63 = vld [vmem:[%s1728_s1 + $0xa0] sm:$0xff]   ;;  %s1173_s14 = sshll.u32 %s1740_s13, 4 }
   0xf   : > { %s165_s23 = scalar_lea.vmem %s1727_s0, %s1172_s20  ;;  %1239 = vmatpush3.bf16.msra.mxu0 %v1374_v3  ;;  %v1395_v0 = vld [vmem:[%s1728_s1 + $0xa8] sm:$0xff]   ;;  %v1396_v2 = vld [vmem:[%s1728_s1 + $0xb0] sm:$0xff]   ;;  %v1397_v3 = vld [vmem:[%s1728_s1 + $0xb8] sm:$0xff]   ;;  %s170_s17 = scalar_lea.vmem %s1730_s3, %s1173_s14 }
  0x10   : > { %v183_v8 = vld [vmem:[%s165_s23] sm:$0xf]  ;;  %v184_v11 = vld [vmem:[%s165_s23 + $0x4] sm:$0xf]  ;;  %1240 = vmatprep.subr.bf16.mxu0 %v1434_v1  ;;  %v1400_v5 = vld [vmem:[%s1729_s2 + $0x48] sm:$0xff]  }
  0x11   : > { %v188_v12 = vshrl.u32 %v183_v8, 16  ;;  %v191_v14 = vshll.u32 %v183_v8, 16  ;;  %v196_v15 = vshrl.u32 %v184_v11, 16  ;;  %v199_v16 = vshll.u32 %v184_v11, 16  ;;  %v209_v28 = vld [vmem:[#allocation2] sm:$0xf]  ;;  %1297 = vmatpush3.bf16.msra.mxu1 %v1400_v5 }
  0x12   : > { %v213_v30 = vld [vmem:[#allocation2 + $0x8] sm:$0x1]  ;;  %v575_v8 = vld [vmem:[#allocation3 + $0x8] sm:$0x1]  ;;  %1298 = vmatprep.subr.bf16.mxu1 %v1434_v1  ;;  %v1403_v10 = vld [vmem:[%s1729_s2 + $0x60] sm:$0xff]  }
  0x13   : > { %v190_v17 = vrot.slane %v188_v12, 7  ;;  %v198_v19 = vrot.slane %v196_v15, 7  ;;  %1241 = vmatpush3.bf16.msra.mxu0 %v1375_v4  ;;  %v572_v4 = vld [vmem:[#allocation3] sm:$0x1]  ;;  %v576_v9 = vsel %vm1498_vm5, 0, %v575_v8  ;;  %v1401_v11 = vld [vmem:[%s1729_s2 + $0x50] sm:$0xff]  }
  0x14   : > { %1242 = vmatprep.subr.bf16.mxu0 %v1434_v1  ;;  %v573_v7 = vsel %vm1491_vm4, 0, %v572_v4  ;;  %577 = vst [vmem:[#allocation3 + $0x8] sm:$0x1] %v576_v9  ;;  %v1402_v12 = vld [vmem:[%s1729_s2 + $0x58] sm:$0xff]   ;;  %v1404_v13 = vld [vmem:[%s1729_s2 + $0x68] sm:$0xff]   ;;  %v1409_v6 = vld [vmem:[%s1729_s2] sm:$0xff]  }
  0x15   : > { %v194_v21 = vrot.slane %v190_v17, 4  ;;  %v193_v22 = vor.u32 %v191_v14, %v190_v17  ;;  %v201_v23 = vor.u32 %v199_v16, %v198_v19  ;;  %v203_v24 = vrot.slane %v198_v19, 4  ;;  %574 = vst [vmem:[#allocation3] sm:$0x1] %v573_v7  ;;  %1299 = vmatpush3.bf16.msra.mxu1 %v1401_v11  ;;  %v1405_v14 = vld [vmem:[%s1729_s2 + $0x70] sm:$0xff]   ;;  %v1406_v15 = vld [vmem:[%s1729_s2 + $0x78] sm:$0xff]  }
  0x16   : > { %1300 = vmatprep.subr.bf16.mxu1 %v1434_v1  ;;  %v1422_v4 = vld [vmem:[%s1729_s2 + $0xa8] sm:$0xff]   ;;  %v1423_v5 = vld [vmem:[%s1729_s2 + $0xb0] sm:$0xff]   ;;  %v1424_v7 = vld [vmem:[%s1729_s2 + $0xb8] sm:$0xff]  }
  0x17   : > { %v202_v26 = vsel %vm1509_vm8, %v194_v21, %v201_v23  ;;  %1243 = vmatpush3.bf16.msra.mxu0 %v1376_v18  ;;  %v210_v29 = vsel %vm1515_vm9, %v193_v22, %v209_v28  ;;  %v214_v31 = vsel %vm1491_vm4, %v203_v24, %v213_v30 }
  0x18   : > { %212 = vst [vmem:[#allocation2 + $0x4] sm:$0xf] %v202_v26  ;;  %1244 = vmatprep.subr.bf16.mxu0 %v1434_v1  ;;  %211 = vst [vmem:[#allocation2] sm:$0xf] %v210_v29 }
  0x19   : > { %215 = vst [vmem:[#allocation2 + $0x8] sm:$0x1] %v214_v31  ;;  %1301 = vmatpush3.bf16.msra.mxu1 %v1402_v12 }
  0x1a   : > { %1302 = vmatprep.subr.bf16.mxu1 %v1434_v1 }
  0x1b   : > { %1245 = vmatpush3.bf16.msra.mxu0 %v1377_v27 }
  0x1c   : > { %1246 = vmatprep.subr.bf16.mxu0 %v1434_v1  ;;  %v604_v30 = vld [vmem:[#allocation3] sm:$0xf] }
  0x1d   : > { %1303 = vmatpush3.bf16.msra.mxu1 %v1403_v10 }
  0x1e   : > { %1304 = vmatprep.subr.bf16.mxu1 %v1434_v1 }
  0x1f   : > { %v217_v33 = vld [vmem:[#allocation2 + $0x4] sm:$0xf]  ;;  %1247 = vmatpush3.bf16.msra.mxu0 %v1378_v32  ;;  %v216_v35 = vld [vmem:[#allocation2] sm:$0xf] }
  0x20   : > { %1248 = vmatprep.subr.bf16.mxu0 %v1434_v1  ;;  %v1066_v36 = vcombine.low %v216_v35, %v217_v33  ;;  %v1381_v37 = vld [vmem:[#allocation2 + $0x8] ss:$0 sps:$4 sm:$0x11]   ;;  %v453_v38 = vld [vmem:[#allocation2] sm:$0xe] }
  0x21   : > { %v269_v41 = vshll.u32 %v1381_v37, 16  ;;  %v1100_v42 = vcombine.low %v453_v38, %v217_v33  ;;  %v476_v44 = vrot.slane %v1381_v37, 1  ;;  %1305 = vmatpush3.bf16.msra.mxu1 %v1404_v13 }
  0x22   : > { %v262_v39 = vshrl.u32 %v1066_v36, 16  ;;  %v264_v40 = vshll.u32 %v1066_v36, 16  ;;  %1306 = vmatprep.subr.bf16.mxu1 %v1434_v1 }
  0x23   : > { %1249 = vmatpush3.bf16.msra.mxu0 %v1379_v34  ;;  %v271_v46 = vrot.slane %v269_v41, 1  ;;  %v475_v48 = vrot.slane %v1100_v42, 1  ;;  %v608_v34 = vld [vmem:[#allocation3 + $0x8] sm:$0x1] }
  0x24   : > { %1254 = vmatprep.subr.bf16.mxu0 %v1434_v1  ;;  %v266_v45 = vrot.slane %v264_v40, 1 }
  0x25   : > { %v477_v50 = vsel %vm474_vm11, %v475_v48, %v476_v44  ;;  %1307 = vmatpush3.bf16.msra.mxu1 %v1405_v14 }
  0x26   : > { %v267_v49 = vor.u32 %v266_v45, %v262_v39  ;;  %1308 = vmatprep.subr.bf16.mxu1 %v1434_v1 }
  0x28   : > { %v272_v51 = vsel %vm260_vm10, %v267_v49, %v271_v46 }
  0x29   : > { %1251 = vmatmul.mubr.bf16.vlgmr.msra.gmra.mrb[0].mxu0 %v272_v51  ;;  %1309 = vmatpush3.bf16.msra.mxu1 %v1406_v15 }
  0x2a   : > { %1255 = vmatpush3.bf16.msra.mxu0 %v1382_v47  ;;  %1270 = vmatprep.mubr.msk.bf16.mxu0 %vm1435_vm0, %v1434_v1 }
  0x2b   : > { %1256 = vmatprep.subr.bf16.mxu0 %v1434_v1  ;;  %1314 = vmatprep.subr.bf16.mxu1 %v1434_v1 }
  0x2e   : > { %1257 = vmatpush3.bf16.msra.mxu0 %v1383_v52 }
  0x2f   : > { %1258 = vmatprep.subr.bf16.mxu0 %v1434_v1 }
  0x32   : > { %1259 = vmatpush3.bf16.msra.mxu0 %v1384_v53 }
  0x33   : > { %1260 = vmatprep.subr.bf16.mxu0 %v1434_v1 }
  0x36   : > { %1261 = vmatpush3.bf16.msra.mxu0 %v1385_v54 }
  0x37   : > { %1262 = vmatprep.subr.bf16.mxu0 %v1434_v1 }
  0x3a   : > { %1263 = vmatpush3.bf16.msra.mxu0 %v1386_v55  ;;  %v1410_v55 = vld [vmem:[%s1729_s2 + $0x8] sm:$0xff]  }
  0x3b   : > { %1264 = vmatprep.subr.bf16.mxu0 %v1434_v1 }
  0x3e   : > { %1265 = vmatpush3.bf16.msra.mxu0 %v1387_v56  ;;  %v1411_v56 = vld [vmem:[%s1729_s2 + $0x10] sm:$0xff]  }
  0x3f   : > { %1266 = vmatprep.subr.bf16.mxu0 %v1434_v1 }
  0x42   : > { %1267 = vmatpush3.bf16.msra.mxu0 %v1388_v57  ;;  %v1412_v57 = vld [vmem:[%s1729_s2 + $0x18] sm:$0xff]  }
  0x43   : > { %1268 = vmatprep.subr.bf16.mxu0 %v1434_v1 }
  0x46   : > { %1269 = vmatpush3.bf16.msra.mxu0 %v1389_v58  ;;  %v1413_v58 = vld [vmem:[%s1729_s2 + $0x20] sm:$0xff]  }
  0x47   : > { %1274 = vmatprep.subr.bf16.mxu0 %v1434_v1 }
  0x49   : > { %1271 = vmatmul.mubr.bf16.vlgmr.msra.gmra.mrb[0].mxu0 %v1066_v36 }
  0x4a   : > { %1275 = vmatpush3.bf16.msra.mxu0 %v1390_v59  ;;  %1290 = vmatprep.mubr.msk.bf16.mxu0 %vm1435_vm0, %v1434_v1  ;;  %v1414_v59 = vld [vmem:[%s1729_s2 + $0x28] sm:$0xff]  }
  0x4b   : > { %1276 = vmatprep.subr.bf16.mxu0 %v1434_v1 }
  0x4e   : > { %1277 = vmatpush3.bf16.msra.mxu0 %v1391_v60  ;;  %v1415_v60 = vld [vmem:[%s1729_s2 + $0x30] sm:$0xff]  }
  0x4f   : > { %1278 = vmatprep.subr.bf16.mxu0 %v1434_v1 }
  0x52   : > { %1279 = vmatpush3.bf16.msra.mxu0 %v1392_v61  ;;  %v1416_v61 = vld [vmem:[%s1729_s2 + $0x38] sm:$0xff]  }
  0x53   : > { %1280 = vmatprep.subr.bf16.mxu0 %v1434_v1 }
  0x56   : > { %1281 = vmatpush3.bf16.msra.mxu0 %v1393_v62  ;;  %v1417_v62 = vld [vmem:[%s1729_s2 + $0x80] sm:$0xff]  }
  0x57   : > { %1282 = vmatprep.subr.bf16.mxu0 %v1434_v1 }
  0x5a   : > { %1283 = vmatpush3.bf16.msra.mxu0 %v1394_v63  ;;  %v1418_v63 = vld [vmem:[%s1729_s2 + $0x88] sm:$0xff]  }
  0x5b   : > { %1284 = vmatprep.subr.bf16.mxu0 %v1434_v1 }
  0x5e   : > { %1285 = vmatpush3.bf16.msra.mxu0 %v1395_v0  ;;  %v1419_v0 = vld [vmem:[%s1729_s2 + $0x90] sm:$0xff]  }
  0x5f   : > { %1286 = vmatprep.subr.bf16.mxu0 %v1434_v1 }
  0x62   : > { %1287 = vmatpush3.bf16.msra.mxu0 %v1396_v2  ;;  %v1420_v2 = vld [vmem:[%s1729_s2 + $0x98] sm:$0xff]  }
  0x63   : > { %1288 = vmatprep.subr.bf16.mxu0 %v1434_v1 }
  0x66   : > { %1289 = vmatpush3.bf16.msra.mxu0 %v1397_v3  ;;  %v1421_v3 = vld [vmem:[%s1729_s2 + $0xa0] sm:$0xff]  }
  0x69   : > { %1291 = vmatmul.mubr.bf16.vlgmr.msra.gmra.mrb[0].mxu0 %v477_v50 }
 0x13c   : > { %v561_v16 = vpop.f32.mrb[0].mxu0 }
 0x13d   : > { %v570_v17 = vmax.f32 %v561_v16, 0.0  ;;  %v1292_v18 = vpop.f32.mrb[1].mxu0 }
 0x13e   : > { %v564_v19 = vpop.f32.mrb[2].mxu0  ;;  %v1177_v18 = vld [vmem:[#allocation2] sm:$0xff]  }
 0x13f   : > { %v1174_v21 = vpack.c.bf16 %v570_v17, %v570_v17  ;;  %v571_v22 = vmax.f32 %v564_v19, 0.0  ;;  %v1293_v23 = vpop.f32.mrb[3].mxu0  ;;  %v965_v19 = vld [vmem:[#allocation2 + $0x8] sm:$0x1] }
 0x140   : > { %v968_v23 = vunpack.c.l.bf16 %v965_v19 }
 0x141   : > { %v585_v24 = vshrl.u32 %v1174_v21, 16  ;;  %v1175_v26 = vpack.c.bf16 %v571_v22, %v571_v22  ;;  %v588_v28 = vshll.u32 %v1174_v21, 16  ;;  %v1178_v21 = vunpack.c.l.bf16 %v1177_v18 }
 0x142   : > { %v1179_v22 = vunpack.c.h.bf16 %v1177_v18 }
 0x143   : > { %v587_v27 = vrot.slane %v585_v24, 7  ;;  %v593_v29 = vshrl.u32 %v1175_v26, 16  ;;  %v596_v33 = vshll.u32 %v1175_v26, 16  ;;  %v973_v24 = vrot.slane %v1178_v21, 1 }
 0x144   : > { %v976_v26 = vrot.slane %v968_v23, 1 }
 0x145   : > { %v590_v31 = vor.u32 %v588_v28, %v587_v27  ;;  %v595_v32 = vrot.slane %v593_v29, 7  ;;  %v591_v35 = vrot.slane %v587_v27, 4 }
 0x147   : > { %v605_v36 = vsel %vm1515_vm9, %v590_v31, %v604_v30  ;;  %v598_v37 = vor.u32 %v596_v33, %v595_v32  ;;  %v600_v38 = vrot.slane %v595_v32, 4 }
 0x148   : > { %606 = vst [vmem:[#allocation3] sm:$0xf] %v605_v36 }
 0x149   : > { %v599_v39 = vsel %vm1509_vm8, %v591_v35, %v598_v37  ;;  %v609_v40 = vsel %vm1491_vm4, %v600_v38, %v608_v34 }
 0x14a   : > { %607 = vst [vmem:[#allocation3 + $0x4] sm:$0xf] %v599_v39  ;;  %610 = vst [vmem:[#allocation3 + $0x8] sm:$0x1] %v609_v40 }
 0x14f   : > { %v611_v41 = vld [vmem:[#allocation3] sm:$0xf] }
 0x150   : > { %v847_v43 = vld [vmem:[#allocation3] sm:$0xe] }
 0x151   : > { %v612_v42 = vld [vmem:[#allocation3 + $0x4] sm:$0xf]  ;;  %v1408_v45 = vld [vmem:[#allocation3 + $0x8] ss:$0 sps:$4 sm:$0x11]  }
 0x152   : > { %v1127_v44 = vcombine.low %v611_v41, %v612_v42  ;;  %v1161_v46 = vcombine.low %v847_v43, %v612_v42  ;;  %v663_v25 = vshll.u32 %v1408_v45, 16  ;;  %v869_v49 = vrot.slane %v1408_v45, 1 }
 0x154   : > { %v658_v47 = vshll.u32 %v1127_v44, 16  ;;  %v868_v48 = vrot.slane %v1161_v46, 1  ;;  %v656_v50 = vshrl.u32 %v1127_v44, 16  ;;  %v665_v53 = vrot.slane %v663_v25, 1 }
 0x156   : > { %v660_v51 = vrot.slane %v658_v47, 1  ;;  %v870_v20 = vsel %vm474_vm11, %v868_v48, %v869_v49 }
 0x158   : > { %v661_v52 = vor.u32 %v660_v51, %v656_v50 }
 0x15a   : > { %v666_v54 = vsel %vm260_vm10, %v661_v52, %v665_v53 }
 0x15b   : > { %1311 = vmatmul.mubr.bf16.vlgmr.msra.gmra.mrb[0].mxu1 %v666_v54 }
 0x15c   : > { %1315 = vmatpush3.bf16.msra.mxu1 %v1409_v6  ;;  %1330 = vmatprep.mubr.msk.bf16.mxu1 %vm1435_vm0, %v1434_v1 }
 0x15d   : > { %1316 = vmatprep.subr.bf16.mxu1 %v1434_v1 }
 0x160   : > { %1317 = vmatpush3.bf16.msra.mxu1 %v1410_v55 }
 0x161   : > { %1318 = vmatprep.subr.bf16.mxu1 %v1434_v1 }
 0x164   : > { %1319 = vmatpush3.bf16.msra.mxu1 %v1411_v56 }
 0x165   : > { %1320 = vmatprep.subr.bf16.mxu1 %v1434_v1 }
 0x168   : > { %1321 = vmatpush3.bf16.msra.mxu1 %v1412_v57 }
 0x169   : > { %1322 = vmatprep.subr.bf16.mxu1 %v1434_v1 }
 0x16c   : > { %1323 = vmatpush3.bf16.msra.mxu1 %v1413_v58 }
 0x16d   : > { %1324 = vmatprep.subr.bf16.mxu1 %v1434_v1 }
 0x170   : > { %1325 = vmatpush3.bf16.msra.mxu1 %v1414_v59 }
 0x171   : > { %1326 = vmatprep.subr.bf16.mxu1 %v1434_v1 }
 0x174   : > { %1327 = vmatpush3.bf16.msra.mxu1 %v1415_v60 }
 0x175   : > { %1328 = vmatprep.subr.bf16.mxu1 %v1434_v1 }
 0x178   : > { %1329 = vmatpush3.bf16.msra.mxu1 %v1416_v61 }
 0x179   : > { %1334 = vmatprep.subr.bf16.mxu1 %v1434_v1 }
 0x17b   : > { %1331 = vmatmul.mubr.bf16.vlgmr.msra.gmra.mrb[4].mxu1 %v1127_v44 }
 0x17c   : > { %1335 = vmatpush3.bf16.msra.mxu1 %v1417_v62  ;;  %1350 = vmatprep.mubr.msk.bf16.mxu1 %vm1435_vm0, %v1434_v1 }
 0x17d   : > { %1336 = vmatprep.subr.bf16.mxu1 %v1434_v1 }
 0x180   : > { %1337 = vmatpush3.bf16.msra.mxu1 %v1418_v63 }
 0x181   : > { %1338 = vmatprep.subr.bf16.mxu1 %v1434_v1 }
 0x184   : > { %1339 = vmatpush3.bf16.msra.mxu1 %v1419_v0 }
 0x185   : > { %1340 = vmatprep.subr.bf16.mxu1 %v1434_v1 }
 0x188   : > { %1341 = vmatpush3.bf16.msra.mxu1 %v1420_v2 }
 0x189   : > { %1342 = vmatprep.subr.bf16.mxu1 %v1434_v1 }
 0x18c   : > { %1343 = vmatpush3.bf16.msra.mxu1 %v1421_v3 }
 0x18d   : > { %1344 = vmatprep.subr.bf16.mxu1 %v1434_v1 }
 0x190   : > { %1345 = vmatpush3.bf16.msra.mxu1 %v1422_v4 }
 0x191   : > { %1346 = vmatprep.subr.bf16.mxu1 %v1434_v1 }
 0x194   : > { %1347 = vmatpush3.bf16.msra.mxu1 %v1423_v5 }
 0x195   : > { %1348 = vmatprep.subr.bf16.mxu1 %v1434_v1  ;;  %v974_v1 = vrot.slane %v1179_v22, 1 }
 0x197   : > { %v975_v28 = vsel %vm474_vm11, %v973_v24, %v974_v1  ;;  %v977_v32 = vsel %vm474_vm11, %v974_v1, %v976_v26 }
 0x198   : > { %1349 = vmatpush3.bf16.msra.mxu1 %v1424_v7 }
 0x19b   : > { %1351 = vmatmul.mubr.bf16.vlgmr.msra.gmra.mrb[8].mxu1 %v870_v20 }
 0x22e   : > { %v750_v8 = vpop.f32.mrb[0].mxu1 }
 0x22f   : > { %v1312_v9 = vpop.f32.mrb[1].mxu1 }
 0x230   : > { %v753_v11 = vpop.f32.mrb[2].mxu1 }
 0x231   : > { %v1313_v12 = vpop.f32.mrb[3].mxu1 }
 0x24e   : > { %v840_v10 = vpop.f32.mrb[4].mxu1 }
 0x24f   : > { %v841_v13 = vadd.f32 %v840_v10, %v750_v8  ;;  %v1332_v14 = vpop.f32.mrb[5].mxu1 }
 0x250   : > { %v843_v15 = vpop.f32.mrb[6].mxu1 }
 0x251   : > { %v844_v16 = vadd.f32 %v843_v15, %v753_v11  ;;  %v1333_v17 = vpop.f32.mrb[7].mxu1 }
 0x26e   : > { %v954_v27 = vpop.f32.mrb[8].mxu1 }
 0x26f   : > { %v961_v29 = vadd.f32 %v954_v27, %v841_v13  ;;  %v1352_v30 = vpop.f32.mrb[9].mxu1 }
 0x270   : > { %v957_v31 = vpop.f32.mrb[10].mxu1 }
 0x271   : > { %v980_v33 = vadd.f32 %v975_v28, %v961_v29  ;;  %v962_v34 = vadd.f32 %v957_v31, %v844_v16  ;;  %v1353_v35 = vpop.f32.mrb[11].mxu1 }
 0x273   : > { %v982_v36 = vmax.f32 %v980_v33, 0.0  ;;  %v981_v37 = vadd.f32 %v977_v32, %v962_v34 }
 0x275   : > { %984 = vst [vmem:[%s170_s17] sm:$0xff] %v982_v36  ;;  %v983_v38 = vmax.f32 %v981_v37, 0.0 }
 0x277   : > { %985 = vst [vmem:[%s170_s17 + $0x8] sm:$0xff] %v983_v38 }
 0x278 PF: > { %s13_s12 = sadd.s32 1, %s1432_s12  }
 0x279   : > { %p10_p4 = scmp.ge.s32.totalorder %s13_s12, 4  }
 0x27b   :  { %12 = sbr.rel (!%p10_p4) target bundleno = 1 (0x1), region = 66 }

</bundles_post_ra>
